<compile_context>
chip_gen: v6e
topology: v6e:2x2x1
jax: 0.10.0
libtpu: 0.0.40
codegen_flags: <defaults>
</compile_context>

<pallas_src>
import functools

import jax
import jax.numpy as jnp
from jax import lax
from jax.experimental import pallas as pl
from jax.experimental.pallas import tpu as pltpu


# --------------------------------------------------------------------------
# Generation-aware VMEM handling
# --------------------------------------------------------------------------
def _vmem_capacity_bytes():
    """Physical VMEM per TensorCore; conservative (v7x-sized) default if unknown."""
    try:
        cap = getattr(pltpu.get_tpu_info(), "vmem_capacity_bytes", None)
        if cap:
            return int(cap)
    except Exception:
        pass
    return 64 * 1024 * 1024  # safe floor for every generation


def _compiler_params(vmem_need, vmem_cap):
    # Always set the scoped-VMEM limit (v5e default is only 16 MiB):
    #   >= 2x the block working set, capped at 75% of physical VMEM
    #   (~48 MiB on v7x, ~96 MiB on v5e/v6e) to leave Mosaic scratch headroom.
    limit = int(min(max(2 * vmem_need, 32 * 1024 * 1024), 0.75 * vmem_cap))
    return pltpu.CompilerParams(
        dimension_semantics=("parallel", "parallel"),
        vmem_limit_bytes=limit,
    )


# --------------------------------------------------------------------------
# Small-channel path: 4-D NCHW blocks, VPU contraction (no wrapper reshapes)
# --------------------------------------------------------------------------
def _vpu_kernel(w_sref, b_sref, x_ref, o_ref, *, c_in, c_out, unroll):
    # w_sref: (C_out*C_in,) f32 in SMEM     b_sref: (C_out,) f32 in SMEM
    # x_ref:  (C_in, TH, W) VMEM block      o_ref:  (C_out, TH, W) VMEM block
    th, w = x_ref.shape[1], x_ref.shape[2]
    for co in range(c_out):  # static unroll: C_out is small on this path

        def body(ci, acc, _co=co):
            return acc + w_sref[_co * c_in + ci] * x_ref[ci].astype(jnp.float32)

        acc = jnp.full((th, w), b_sref[co], dtype=jnp.float32)
        acc = lax.fori_loop(0, c_in, body, acc, unroll=unroll)
        o_ref[co] = acc.astype(o_ref.dtype)


def _pick_tile_h(H, W, c_in, c_out, itemsize, vmem_budget):
    # Per-channel f32 accumulator is (TH, W): keep it around <=16 vregs
    # (ceil(TH/8) * ceil(W/128) <= 16) so the fori carry + loaded slice
    # never spill; also respect the double-buffered in+out VMEM budget.
    lane_tiles = -(-W // 128)
    cap = max(8, (16 * 8) // lane_tiles)
    bytes_per_row = 2 * (c_in + c_out) * W * itemsize
    cap = min(cap, max(8, vmem_budget // max(1, bytes_per_row)))
    if H <= cap:
        return H                     # full dim is always a legal block extent
    return max(8, (cap // 8) * 8)    # multiple of 8 keeps the (8,128) rule happy


def _outconv_vpu(x, w_mat, bias, vmem_cap):
    N, C_in, H, W = x.shape
    C_out = w_mat.shape[0]
    isz = jnp.dtype(x.dtype).itemsize
    budget = int(0.40 * vmem_cap)

    th = _pick_tile_h(H, W, C_in, C_out, isz, budget)
    num_t = pl.cdiv(H, th)

    # Scalars live in SMEM via scalar prefetch (cheap per-(co,ci) reads).
    w_flat = w_mat.astype(jnp.float32).reshape(-1)   # (C_out*C_in,)
    b_vec = bias.astype(jnp.float32).reshape(-1)     # (C_out,)

    # Megacore (v7x): larger parallel axis first so both TCs get work.
    if N >= num_t:
        grid = (N, num_t)
        idx = lambda n, t, w_s, b_s: (n, 0, t, 0)
    else:
        grid = (num_t, N)
        idx = lambda t, n, w_s, b_s: (n, 0, t, 0)

    kernel = functools.partial(
        _vpu_kernel, c_in=C_in, c_out=C_out, unroll=(C_in <= 16)
    )
    vmem_need = 2 * (C_in + C_out) * th * W * isz

    cost = pl.CostEstimate(
        flops=2 * N * H * W * C_in * C_out,
        transcendentals=0,
        bytes_accessed=(x.size + w_flat.size + b_vec.size + N * C_out * H * W) * isz,
    )

    return pl.pallas_call(
        kernel,
        out_shape=jax.ShapeDtypeStruct((N, C_out, H, W), x.dtype),
        grid_spec=pltpu.PrefetchScalarGridSpec(
            num_scalar_prefetch=2,
            grid=grid,
            in_specs=[pl.BlockSpec((pl.Squeezed(), C_in, th, W), idx)],
            out_specs=pl.BlockSpec((pl.Squeezed(), C_out, th, W), idx),
        ),
        compiler_params=_compiler_params(vmem_need, vmem_cap),
        cost_estimate=cost,
    )(w_flat, b_vec, x)


# --------------------------------------------------------------------------
# Large-channel fallback: lane-dense flattened spatial tiles on the MXU
# --------------------------------------------------------------------------
def _mxu_kernel(x_ref, w_ref, b_ref, o_ref):
    # x_ref: (C_in, TM)  w_ref: (C_out, C_in)  b_ref: (C_out, 1)  o_ref: (C_out, TM)
    acc = jnp.dot(w_ref[...], x_ref[...], preferred_element_type=jnp.float32)
    o_ref[...] = (acc + b_ref[...]).astype(o_ref.dtype)


def _pick_tile_m(M, c_in, c_out, itemsize, vmem_budget):
    if M <= 128:
        return M
    tile = vmem_budget // (2 * (c_in + c_out) * itemsize)
    # Epilogue vreg pressure: (C_out, tile) f32 -> ceil(C_out/8)*tile/128 <= 32 vregs.
    tile = min(tile, (32 * 128) // max(1, (c_out + 7) // 8))
    tile = min(tile, M)
    return max(128, (tile // 128) * 128)


def _outconv_mxu(x, w_mat, bias, vmem_cap):
    N, C_in, H, W = x.shape
    C_out = w_mat.shape[0]
    M = H * W
    isz = jnp.dtype(x.dtype).itemsize

    # TODO(synk): this (H, W) -> (H*W) collapse can force an XLA relayout copy
    # around the pallas_call. Mosaic does not reliably lower an in-kernel
    # collapse of the two minor dims (or a rank-3 dot_general), so the
    # large-channel path accepts it; the small-channel path avoids it entirely.
    x3 = x.reshape(N, C_in, M)
    w2 = w_mat.astype(x.dtype)
    b2 = bias.astype(jnp.float32).reshape(C_out, 1)

    budget = int(0.40 * vmem_cap)
    tm = _pick_tile_m(M, C_in, C_out, isz, budget)
    num_m = pl.cdiv(M, tm)

    if N >= num_m:
        grid = (N, num_m)
        xmap = lambda n, m: (n, 0, m)
        cmap = lambda n, m: (0, 0)
    else:
        grid = (num_m, N)
        xmap = lambda m, n: (n, 0, m)
        cmap = lambda m, n: (0, 0)

    vmem_need = (2 * (C_in + C_out) * tm + C_out * C_in + C_out) * isz
    cost = pl.CostEstimate(
        flops=2 * N * M * C_in * C_out,
        transcendentals=0,
        bytes_accessed=(x3.size + w2.size + b2.size + N * C_out * M) * isz,
    )

    y3 = pl.pallas_call(
        _mxu_kernel,
        out_shape=jax.ShapeDtypeStruct((N, C_out, M), x.dtype),
        grid_spec=pltpu.PrefetchScalarGridSpec(
            num_scalar_prefetch=0,
            grid=grid,
            in_specs=[
                pl.BlockSpec((pl.Squeezed(), C_in, tm), xmap),
                # Constant-index resident operands: single-buffered.
                pl.BlockSpec((C_out, C_in), cmap, pipeline_mode=pl.Buffered(1)),
                pl.BlockSpec((C_out, 1), cmap, pipeline_mode=pl.Buffered(1)),
            ],
            out_specs=pl.BlockSpec((pl.Squeezed(), C_out, tm), xmap),
        ),
        compiler_params=_compiler_params(vmem_need, vmem_cap),
        cost_estimate=cost,
    )(x3, w2, b2)
    return y3.reshape(N, C_out, H, W)


# --------------------------------------------------------------------------
# Public wrapper (matches nn.Conv2d(in_ch, out_ch, kernel_size=1))
# --------------------------------------------------------------------------
def outconv_forward(x_nchw, weight, bias):
    """x: (N, C_in, H, W); weight: (C_out, C_in, 1, 1); bias: (C_out,)."""
    N, C_in, H, W = x_nchw.shape
    C_out = weight.shape[0]
    w_mat = weight.reshape(C_out, C_in)
    vmem_cap = _vmem_capacity_bytes()

    # VPU path stays at the HBM roofline while C_in*C_out/(C_in+C_out) is small
    # (typical OutConv head); larger channel products go to the MXU fallback.
    if C_in * C_out <= 16 * (C_in + C_out):
        return _outconv_vpu(x_nchw, w_mat, bias, vmem_cap)
    return _outconv_mxu(x_nchw, w_mat, bias, vmem_cap)


if __name__ == "__main__":
    in_channel, out_channel = 4, 8
    N, H, W = 2, 16, 16

    key = jax.random.PRNGKey(0)
    k_x, k_w, k_b = jax.random.split(key, 3)

    x = jax.random.normal(k_x, (N, in_channel, H, W), dtype=jnp.float32)
    # PyTorch Conv2d init shapes: weight (out, in, 1, 1), bias (out,)
    fan_in = in_channel
    bound = 1.0 / (fan_in ** 0.5)
    weight = jax.random.uniform(k_w, (out_channel, in_channel, 1, 1),
                                minval=-bound, maxval=bound, dtype=jnp.float32)
    bias = jax.random.uniform(k_b, (out_channel,),
                              minval=-bound, maxval=bound, dtype=jnp.float32)

    y = outconv_forward(x, weight, bias)
    y = jax.block_until_ready(y)

    ref = jnp.einsum("nchw,oc->nohw", x, weight.reshape(out_channel, in_channel))
    ref = ref + bias.reshape(1, out_channel, 1, 1)
    assert y.shape == (N, out_channel, H, W)
    assert jnp.allclose(y, ref, atol=1e-5, rtol=1e-5), float(jnp.max(jnp.abs(y - ref)))

    print("KERNEL_OK")
</pallas_src>

<mosaic_0001>
module attributes {stable_mosaic.version = 11 : i64} {
  func.func @_vpu_kernel(%arg0: i32, %arg1: i32, %arg2: memref<32xf32, #tpu.memory_space<smem>>, %arg3: memref<8xf32, #tpu.memory_space<smem>>, %arg4: memref<1x4x16x16xf32, #tpu.memory_space<vmem>>, %arg5: memref<1x8x16x16xf32, #tpu.memory_space<vmem>>) attributes {dimension_semantics = [#tpu.dimension_semantics<parallel>, #tpu.dimension_semantics<parallel>], iteration_bounds = array<i64: 2, 1>, scalar_prefetch = 2 : i64, scratch_operands = 0 : i64, tpu.core_type = #tpu.core_type<tc>, window_params = [{transform_indices = @transform_0, window_bounds = array<i64: 1, 4, 16, 16>}, {transform_indices = @transform_1, window_bounds = array<i64: 1, 8, 16, 16>}]} {
    %c0 = arith.constant 0 : index
    %0 = memref.load %arg3[%c0] : memref<8xf32, #tpu.memory_space<smem>>
    %1 = vector.broadcast %0 : f32 to vector<16x16xf32>
    %c0_i32 = arith.constant 0 : i32
    %c0_i32_0 = arith.constant 0 : i32
    %2 = arith.addi %c0_i32_0, %c0_i32 : i32
    %3 = arith.index_cast %2 : i32 to index
    %4 = memref.load %arg2[%3] : memref<32xf32, #tpu.memory_space<smem>>
    %c0_1 = arith.constant 0 : index
    %5 = arith.index_cast %c0_i32 : i32 to index
    %c0_2 = arith.constant 0 : index
    %c0_3 = arith.constant 0 : index
    %6 = vector.load %arg4[%c0_1, %5, %c0_2, %c0_3] : memref<1x4x16x16xf32, #tpu.memory_space<vmem>>, vector<1x1x16x16xf32>
    %7 = vector.shape_cast %6 : vector<1x1x16x16xf32> to vector<16x16xf32>
    %8 = vector.broadcast %4 : f32 to vector<16x16xf32>
    %9 = arith.mulf %8, %7 : vector<16x16xf32>
    %10 = arith.addf %1, %9 : vector<16x16xf32>
    %c1_i32 = arith.constant 1 : i32
    %c0_i32_4 = arith.constant 0 : i32
    %11 = arith.addi %c0_i32_4, %c1_i32 : i32
    %12 = arith.index_cast %11 : i32 to index
    %13 = memref.load %arg2[%12] : memref<32xf32, #tpu.memory_space<smem>>
    %c0_5 = arith.constant 0 : index
    %14 = arith.index_cast %c1_i32 : i32 to index
    %c0_6 = arith.constant 0 : index
    %c0_7 = arith.constant 0 : index
    %15 = vector.load %arg4[%c0_5, %14, %c0_6, %c0_7] : memref<1x4x16x16xf32, #tpu.memory_space<vmem>>, vector<1x1x16x16xf32>
    %16 = vector.shape_cast %15 : vector<1x1x16x16xf32> to vector<16x16xf32>
    %17 = vector.broadcast %13 : f32 to vector<16x16xf32>
    %18 = arith.mulf %17, %16 : vector<16x16xf32>
    %19 = arith.addf %10, %18 : vector<16x16xf32>
    %c2_i32 = arith.constant 2 : i32
    %c0_i32_8 = arith.constant 0 : i32
    %20 = arith.addi %c0_i32_8, %c2_i32 : i32
    %21 = arith.index_cast %20 : i32 to index
    %22 = memref.load %arg2[%21] : memref<32xf32, #tpu.memory_space<smem>>
    %c0_9 = arith.constant 0 : index
    %23 = arith.index_cast %c2_i32 : i32 to index
    %c0_10 = arith.constant 0 : index
    %c0_11 = arith.constant 0 : index
    %24 = vector.load %arg4[%c0_9, %23, %c0_10, %c0_11] : memref<1x4x16x16xf32, #tpu.memory_space<vmem>>, vector<1x1x16x16xf32>
    %25 = vector.shape_cast %24 : vector<1x1x16x16xf32> to vector<16x16xf32>
    %26 = vector.broadcast %22 : f32 to vector<16x16xf32>
    %27 = arith.mulf %26, %25 : vector<16x16xf32>
    %28 = arith.addf %19, %27 : vector<16x16xf32>
    %c3_i32 = arith.constant 3 : i32
    %c0_i32_12 = arith.constant 0 : i32
    %29 = arith.addi %c0_i32_12, %c3_i32 : i32
    %30 = arith.index_cast %29 : i32 to index
    %31 = memref.load %arg2[%30] : memref<32xf32, #tpu.memory_space<smem>>
    %c0_13 = arith.constant 0 : index
    %32 = arith.index_cast %c3_i32 : i32 to index
    %c0_14 = arith.constant 0 : index
    %c0_15 = arith.constant 0 : index
    %33 = vector.load %arg4[%c0_13, %32, %c0_14, %c0_15] : memref<1x4x16x16xf32, #tpu.memory_space<vmem>>, vector<1x1x16x16xf32>
    %34 = vector.shape_cast %33 : vector<1x1x16x16xf32> to vector<16x16xf32>
    %35 = vector.broadcast %31 : f32 to vector<16x16xf32>
    %36 = arith.mulf %35, %34 : vector<16x16xf32>
    %37 = arith.addf %28, %36 : vector<16x16xf32>
    %c4_i32 = arith.constant 4 : i32
    %c0_16 = arith.constant 0 : index
    %c0_17 = arith.constant 0 : index
    %c0_18 = arith.constant 0 : index
    %c0_19 = arith.constant 0 : index
    %38 = vector.load %arg5[%c0_16, %c0_17, %c0_18, %c0_19] : memref<1x8x16x16xf32, #tpu.memory_space<vmem>>, vector<1x1x16x16xf32>
    %39 = vector.shape_cast %38 : vector<1x1x16x16xf32> to vector<16x16xf32>
    %40 = vector.shape_cast %37 : vector<16x16xf32> to vector<1x1x16x16xf32>
    tpu.vector_store %arg5[%c0_16, %c0_17, %c0_18, %c0_19], %40 {strides = array<i32>} : memref<1x8x16x16xf32, #tpu.memory_space<vmem>>, vector<1x1x16x16xf32>,
    %c1 = arith.constant 1 : index
    %41 = memref.load %arg3[%c1] : memref<8xf32, #tpu.memory_space<smem>>
    %42 = vector.broadcast %41 : f32 to vector<16x16xf32>
    %c0_i32_20 = arith.constant 0 : i32
    %c4_i32_21 = arith.constant 4 : i32
    %43 = arith.addi %c4_i32_21, %c0_i32_20 : i32
    %44 = arith.index_cast %43 : i32 to index
    %45 = memref.load %arg2[%44] : memref<32xf32, #tpu.memory_space<smem>>
    %c0_22 = arith.constant 0 : index
    %46 = arith.index_cast %c0_i32_20 : i32 to index
    %c0_23 = arith.constant 0 : index
    %c0_24 = arith.constant 0 : index
    %47 = vector.load %arg4[%c0_22, %46, %c0_23, %c0_24] : memref<1x4x16x16xf32, #tpu.memory_space<vmem>>, vector<1x1x16x16xf32>
    %48 = vector.shape_cast %47 : vector<1x1x16x16xf32> to vector<16x16xf32>
    %49 = vector.broadcast %45 : f32 to vector<16x16xf32>
    %50 = arith.mulf %49, %48 : vector<16x16xf32>
    %51 = arith.addf %42, %50 : vector<16x16xf32>
    %c1_i32_25 = arith.constant 1 : i32
    %c4_i32_26 = arith.constant 4 : i32
    %52 = arith.addi %c4_i32_26, %c1_i32_25 : i32
    %53 = arith.index_cast %52 : i32 to index
    %54 = memref.load %arg2[%53] : memref<32xf32, #tpu.memory_space<smem>>
    %c0_27 = arith.constant 0 : index
    %55 = arith.index_cast %c1_i32_25 : i32 to index
    %c0_28 = arith.constant 0 : index
    %c0_29 = arith.constant 0 : index
    %56 = vector.load %arg4[%c0_27, %55, %c0_28, %c0_29] : memref<1x4x16x16xf32, #tpu.memory_space<vmem>>, vector<1x1x16x16xf32>
    %57 = vector.shape_cast %56 : vector<1x1x16x16xf32> to vector<16x16xf32>
    %58 = vector.broadcast %54 : f32 to vector<16x16xf32>
    %59 = arith.mulf %58, %57 : vector<16x16xf32>
    %60 = arith.addf %51, %59 : vector<16x16xf32>
    %c2_i32_30 = arith.constant 2 : i32
    %c4_i32_31 = arith.constant 4 : i32
    %61 = arith.addi %c4_i32_31, %c2_i32_30 : i32
    %62 = arith.index_cast %61 : i32 to index
    %63 = memref.load %arg2[%62] : memref<32xf32, #tpu.memory_space<smem>>
    %c0_32 = arith.constant 0 : index
    %64 = arith.index_cast %c2_i32_30 : i32 to index
    %c0_33 = arith.constant 0 : index
    %c0_34 = arith.constant 0 : index
    %65 = vector.load %arg4[%c0_32, %64, %c0_33, %c0_34] : memref<1x4x16x16xf32, #tpu.memory_space<vmem>>, vector<1x1x16x16xf32>
    %66 = vector.shape_cast %65 : vector<1x1x16x16xf32> to vector<16x16xf32>
    %67 = vector.broadcast %63 : f32 to vector<16x16xf32>
    %68 = arith.mulf %67, %66 : vector<16x16xf32>
    %69 = arith.addf %60, %68 : vector<16x16xf32>
    %c3_i32_35 = arith.constant 3 : i32
    %c4_i32_36 = arith.constant 4 : i32
    %70 = arith.addi %c4_i32_36, %c3_i32_35 : i32
    %71 = arith.index_cast %70 : i32 to index
    %72 = memref.load %arg2[%71] : memref<32xf32, #tpu.memory_space<smem>>
    %c0_37 = arith.constant 0 : index
    %73 = arith.index_cast %c3_i32_35 : i32 to index
    %c0_38 = arith.constant 0 : index
    %c0_39 = arith.constant 0 : index
    %74 = vector.load %arg4[%c0_37, %73, %c0_38, %c0_39] : memref<1x4x16x16xf32, #tpu.memory_space<vmem>>, vector<1x1x16x16xf32>
    %75 = vector.shape_cast %74 : vector<1x1x16x16xf32> to vector<16x16xf32>
    %76 = vector.broadcast %72 : f32 to vector<16x16xf32>
    %77 = arith.mulf %76, %75 : vector<16x16xf32>
    %78 = arith.addf %69, %77 : vector<16x16xf32>
    %c4_i32_40 = arith.constant 4 : i32
    %c0_41 = arith.constant 0 : index
    %c1_42 = arith.constant 1 : index
    %c0_43 = arith.constant 0 : index
    %c0_44 = arith.constant 0 : index
    %79 = vector.load %arg5[%c0_41, %c1_42, %c0_43, %c0_44] : memref<1x8x16x16xf32, #tpu.memory_space<vmem>>, vector<1x1x16x16xf32>
    %80 = vector.shape_cast %79 : vector<1x1x16x16xf32> to vector<16x16xf32>
    %81 = vector.shape_cast %78 : vector<16x16xf32> to vector<1x1x16x16xf32>
    tpu.vector_store %arg5[%c0_41, %c1_42, %c0_43, %c0_44], %81 {strides = array<i32>} : memref<1x8x16x16xf32, #tpu.memory_space<vmem>>, vector<1x1x16x16xf32>,
    %c2 = arith.constant 2 : index
    %82 = memref.load %arg3[%c2] : memref<8xf32, #tpu.memory_space<smem>>
    %83 = vector.broadcast %82 : f32 to vector<16x16xf32>
    %c0_i32_45 = arith.constant 0 : i32
    %c8_i32 = arith.constant 8 : i32
    %84 = arith.addi %c8_i32, %c0_i32_45 : i32
    %85 = arith.index_cast %84 : i32 to index
    %86 = memref.load %arg2[%85] : memref<32xf32, #tpu.memory_space<smem>>
    %c0_46 = arith.constant 0 : index
    %87 = arith.index_cast %c0_i32_45 : i32 to index
    %c0_47 = arith.constant 0 : index
    %c0_48 = arith.constant 0 : index
    %88 = vector.load %arg4[%c0_46, %87, %c0_47, %c0_48] : memref<1x4x16x16xf32, #tpu.memory_space<vmem>>, vector<1x1x16x16xf32>
    %89 = vector.shape_cast %88 : vector<1x1x16x16xf32> to vector<16x16xf32>
    %90 = vector.broadcast %86 : f32 to vector<16x16xf32>
    %91 = arith.mulf %90, %89 : vector<16x16xf32>
    %92 = arith.addf %83, %91 : vector<16x16xf32>
    %c1_i32_49 = arith.constant 1 : i32
    %c8_i32_50 = arith.constant 8 : i32
    %93 = arith.addi %c8_i32_50, %c1_i32_49 : i32
    %94 = arith.index_cast %93 : i32 to index
    %95 = memref.load %arg2[%94] : memref<32xf32, #tpu.memory_space<smem>>
    %c0_51 = arith.constant 0 : index
    %96 = arith.index_cast %c1_i32_49 : i32 to index
    %c0_52 = arith.constant 0 : index
    %c0_53 = arith.constant 0 : index
    %97 = vector.load %arg4[%c0_51, %96, %c0_52, %c0_53] : memref<1x4x16x16xf32, #tpu.memory_space<vmem>>, vector<1x1x16x16xf32>
    %98 = vector.shape_cast %97 : vector<1x1x16x16xf32> to vector<16x16xf32>
    %99 = vector.broadcast %95 : f32 to vector<16x16xf32>
    %100 = arith.mulf %99, %98 : vector<16x16xf32>
    %101 = arith.addf %92, %100 : vector<16x16xf32>
    %c2_i32_54 = arith.constant 2 : i32
    %c8_i32_55 = arith.constant 8 : i32
    %102 = arith.addi %c8_i32_55, %c2_i32_54 : i32
    %103 = arith.index_cast %102 : i32 to index
    %104 = memref.load %arg2[%103] : memref<32xf32, #tpu.memory_space<smem>>
    %c0_56 = arith.constant 0 : index
    %105 = arith.index_cast %c2_i32_54 : i32 to index
    %c0_57 = arith.constant 0 : index
    %c0_58 = arith.constant 0 : index
    %106 = vector.load %arg4[%c0_56, %105, %c0_57, %c0_58] : memref<1x4x16x16xf32, #tpu.memory_space<vmem>>, vector<1x1x16x16xf32>
    %107 = vector.shape_cast %106 : vector<1x1x16x16xf32> to vector<16x16xf32>
    %108 = vector.broadcast %104 : f32 to vector<16x16xf32>
    %109 = arith.mulf %108, %107 : vector<16x16xf32>
    %110 = arith.addf %101, %109 : vector<16x16xf32>
    %c3_i32_59 = arith.constant 3 : i32
    %c8_i32_60 = arith.constant 8 : i32
    %111 = arith.addi %c8_i32_60, %c3_i32_59 : i32
    %112 = arith.index_cast %111 : i32 to index
    %113 = memref.load %arg2[%112] : memref<32xf32, #tpu.memory_space<smem>>
    %c0_61 = arith.constant 0 : index
    %114 = arith.index_cast %c3_i32_59 : i32 to index
    %c0_62 = arith.constant 0 : index
    %c0_63 = arith.constant 0 : index
    %115 = vector.load %arg4[%c0_61, %114, %c0_62, %c0_63] : memref<1x4x16x16xf32, #tpu.memory_space<vmem>>, vector<1x1x16x16xf32>
    %116 = vector.shape_cast %115 : vector<1x1x16x16xf32> to vector<16x16xf32>
    %117 = vector.broadcast %113 : f32 to vector<16x16xf32>
    %118 = arith.mulf %117, %116 : vector<16x16xf32>
    %119 = arith.addf %110, %118 : vector<16x16xf32>
    %c4_i32_64 = arith.constant 4 : i32
    %c0_65 = arith.constant 0 : index
    %c2_66 = arith.constant 2 : index
    %c0_67 = arith.constant 0 : index
    %c0_68 = arith.constant 0 : index
    %120 = vector.load %arg5[%c0_65, %c2_66, %c0_67, %c0_68] : memref<1x8x16x16xf32, #tpu.memory_space<vmem>>, vector<1x1x16x16xf32>
    %121 = vector.shape_cast %120 : vector<1x1x16x16xf32> to vector<16x16xf32>
    %122 = vector.shape_cast %119 : vector<16x16xf32> to vector<1x1x16x16xf32>
    tpu.vector_store %arg5[%c0_65, %c2_66, %c0_67, %c0_68], %122 {strides = array<i32>} : memref<1x8x16x16xf32, #tpu.memory_space<vmem>>, vector<1x1x16x16xf32>,
    %c3 = arith.constant 3 : index
    %123 = memref.load %arg3[%c3] : memref<8xf32, #tpu.memory_space<smem>>
    %124 = vector.broadcast %123 : f32 to vector<16x16xf32>
    %c0_i32_69 = arith.constant 0 : i32
    %c12_i32 = arith.constant 12 : i32
    %125 = arith.addi %c12_i32, %c0_i32_69 : i32
    %126 = arith.index_cast %125 : i32 to index
    %127 = memref.load %arg2[%126] : memref<32xf32, #tpu.memory_space<smem>>
    %c0_70 = arith.constant 0 : index
    %128 = arith.index_cast %c0_i32_69 : i32 to index
    %c0_71 = arith.constant 0 : index
    %c0_72 = arith.constant 0 : index
    %129 = vector.load %arg4[%c0_70, %128, %c0_71, %c0_72] : memref<1x4x16x16xf32, #tpu.memory_space<vmem>>, vector<1x1x16x16xf32>
    %130 = vector.shape_cast %129 : vector<1x1x16x16xf32> to vector<16x16xf32>
    %131 = vector.broadcast %127 : f32 to vector<16x16xf32>
    %132 = arith.mulf %131, %130 : vector<16x16xf32>
    %133 = arith.addf %124, %132 : vector<16x16xf32>
    %c1_i32_73 = arith.constant 1 : i32
    %c12_i32_74 = arith.constant 12 : i32
    %134 = arith.addi %c12_i32_74, %c1_i32_73 : i32
    %135 = arith.index_cast %134 : i32 to index
    %136 = memref.load %arg2[%135] : memref<32xf32, #tpu.memory_space<smem>>
    %c0_75 = arith.constant 0 : index
    %137 = arith.index_cast %c1_i32_73 : i32 to index
    %c0_76 = arith.constant 0 : index
    %c0_77 = arith.constant 0 : index
    %138 = vector.load %arg4[%c0_75, %137, %c0_76, %c0_77] : memref<1x4x16x16xf32, #tpu.memory_space<vmem>>, vector<1x1x16x16xf32>
    %139 = vector.shape_cast %138 : vector<1x1x16x16xf32> to vector<16x16xf32>
    %140 = vector.broadcast %136 : f32 to vector<16x16xf32>
    %141 = arith.mulf %140, %139 : vector<16x16xf32>
    %142 = arith.addf %133, %141 : vector<16x16xf32>
    %c2_i32_78 = arith.constant 2 : i32
    %c12_i32_79 = arith.constant 12 : i32
    %143 = arith.addi %c12_i32_79, %c2_i32_78 : i32
    %144 = arith.index_cast %143 : i32 to index
    %145 = memref.load %arg2[%144] : memref<32xf32, #tpu.memory_space<smem>>
    %c0_80 = arith.constant 0 : index
    %146 = arith.index_cast %c2_i32_78 : i32 to index
    %c0_81 = arith.constant 0 : index
    %c0_82 = arith.constant 0 : index
    %147 = vector.load %arg4[%c0_80, %146, %c0_81, %c0_82] : memref<1x4x16x16xf32, #tpu.memory_space<vmem>>, vector<1x1x16x16xf32>
    %148 = vector.shape_cast %147 : vector<1x1x16x16xf32> to vector<16x16xf32>
    %149 = vector.broadcast %145 : f32 to vector<16x16xf32>
    %150 = arith.mulf %149, %148 : vector<16x16xf32>
    %151 = arith.addf %142, %150 : vector<16x16xf32>
    %c3_i32_83 = arith.constant 3 : i32
    %c12_i32_84 = arith.constant 12 : i32
    %152 = arith.addi %c12_i32_84, %c3_i32_83 : i32
    %153 = arith.index_cast %152 : i32 to index
    %154 = memref.load %arg2[%153] : memref<32xf32, #tpu.memory_space<smem>>
    %c0_85 = arith.constant 0 : index
    %155 = arith.index_cast %c3_i32_83 : i32 to index
    %c0_86 = arith.constant 0 : index
    %c0_87 = arith.constant 0 : index
    %156 = vector.load %arg4[%c0_85, %155, %c0_86, %c0_87] : memref<1x4x16x16xf32, #tpu.memory_space<vmem>>, vector<1x1x16x16xf32>
    %157 = vector.shape_cast %156 : vector<1x1x16x16xf32> to vector<16x16xf32>
    %158 = vector.broadcast %154 : f32 to vector<16x16xf32>
    %159 = arith.mulf %158, %157 : vector<16x16xf32>
    %160 = arith.addf %151, %159 : vector<16x16xf32>
    %c4_i32_88 = arith.constant 4 : i32
    %c0_89 = arith.constant 0 : index
    %c3_90 = arith.constant 3 : index
    %c0_91 = arith.constant 0 : index
    %c0_92 = arith.constant 0 : index
    %161 = vector.load %arg5[%c0_89, %c3_90, %c0_91, %c0_92] : memref<1x8x16x16xf32, #tpu.memory_space<vmem>>, vector<1x1x16x16xf32>
    %162 = vector.shape_cast %161 : vector<1x1x16x16xf32> to vector<16x16xf32>
    %163 = vector.shape_cast %160 : vector<16x16xf32> to vector<1x1x16x16xf32>
    tpu.vector_store %arg5[%c0_89, %c3_90, %c0_91, %c0_92], %163 {strides = array<i32>} : memref<1x8x16x16xf32, #tpu.memory_space<vmem>>, vector<1x1x16x16xf32>,
    %c4 = arith.constant 4 : index
    %164 = memref.load %arg3[%c4] : memref<8xf32, #tpu.memory_space<smem>>
    %165 = vector.broadcast %164 : f32 to vector<16x16xf32>
    %c0_i32_93 = arith.constant 0 : i32
    %c16_i32 = arith.constant 16 : i32
    %166 = arith.addi %c16_i32, %c0_i32_93 : i32
    %167 = arith.index_cast %166 : i32 to index
    %168 = memref.load %arg2[%167] : memref<32xf32, #tpu.memory_space<smem>>
    %c0_94 = arith.constant 0 : index
    %169 = arith.index_cast %c0_i32_93 : i32 to index
    %c0_95 = arith.constant 0 : index
    %c0_96 = arith.constant 0 : index
    %170 = vector.load %arg4[%c0_94, %169, %c0_95, %c0_96] : memref<1x4x16x16xf32, #tpu.memory_space<vmem>>, vector<1x1x16x16xf32>
    %171 = vector.shape_cast %170 : vector<1x1x16x16xf32> to vector<16x16xf32>
    %172 = vector.broadcast %168 : f32 to vector<16x16xf32>
    %173 = arith.mulf %172, %171 : vector<16x16xf32>
    %174 = arith.addf %165, %173 : vector<16x16xf32>
    %c1_i32_97 = arith.constant 1 : i32
    %c16_i32_98 = arith.constant 16 : i32
    %175 = arith.addi %c16_i32_98, %c1_i32_97 : i32
    %176 = arith.index_cast %175 : i32 to index
    %177 = memref.load %arg2[%176] : memref<32xf32, #tpu.memory_space<smem>>
    %c0_99 = arith.constant 0 : index
    %178 = arith.index_cast %c1_i32_97 : i32 to index
    %c0_100 = arith.constant 0 : index
    %c0_101 = arith.constant 0 : index
    %179 = vector.load %arg4[%c0_99, %178, %c0_100, %c0_101] : memref<1x4x16x16xf32, #tpu.memory_space<vmem>>, vector<1x1x16x16xf32>
    %180 = vector.shape_cast %179 : vector<1x1x16x16xf32> to vector<16x16xf32>
    %181 = vector.broadcast %177 : f32 to vector<16x16xf32>
    %182 = arith.mulf %181, %180 : vector<16x16xf32>
    %183 = arith.addf %174, %182 : vector<16x16xf32>
    %c2_i32_102 = arith.constant 2 : i32
    %c16_i32_103 = arith.constant 16 : i32
    %184 = arith.addi %c16_i32_103, %c2_i32_102 : i32
    %185 = arith.index_cast %184 : i32 to index
    %186 = memref.load %arg2[%185] : memref<32xf32, #tpu.memory_space<smem>>
    %c0_104 = arith.constant 0 : index
    %187 = arith.index_cast %c2_i32_102 : i32 to index
    %c0_105 = arith.constant 0 : index
    %c0_106 = arith.constant 0 : index
    %188 = vector.load %arg4[%c0_104, %187, %c0_105, %c0_106] : memref<1x4x16x16xf32, #tpu.memory_space<vmem>>, vector<1x1x16x16xf32>
    %189 = vector.shape_cast %188 : vector<1x1x16x16xf32> to vector<16x16xf32>
    %190 = vector.broadcast %186 : f32 to vector<16x16xf32>
    %191 = arith.mulf %190, %189 : vector<16x16xf32>
    %192 = arith.addf %183, %191 : vector<16x16xf32>
    %c3_i32_107 = arith.constant 3 : i32
    %c16_i32_108 = arith.constant 16 : i32
    %193 = arith.addi %c16_i32_108, %c3_i32_107 : i32
    %194 = arith.index_cast %193 : i32 to index
    %195 = memref.load %arg2[%194] : memref<32xf32, #tpu.memory_space<smem>>
    %c0_109 = arith.constant 0 : index
    %196 = arith.index_cast %c3_i32_107 : i32 to index
    %c0_110 = arith.constant 0 : index
    %c0_111 = arith.constant 0 : index
    %197 = vector.load %arg4[%c0_109, %196, %c0_110, %c0_111] : memref<1x4x16x16xf32, #tpu.memory_space<vmem>>, vector<1x1x16x16xf32>
    %198 = vector.shape_cast %197 : vector<1x1x16x16xf32> to vector<16x16xf32>
    %199 = vector.broadcast %195 : f32 to vector<16x16xf32>
    %200 = arith.mulf %199, %198 : vector<16x16xf32>
    %201 = arith.addf %192, %200 : vector<16x16xf32>
    %c4_i32_112 = arith.constant 4 : i32
    %c0_113 = arith.constant 0 : index
    %c4_114 = arith.constant 4 : index
    %c0_115 = arith.constant 0 : index
    %c0_116 = arith.constant 0 : index
    %202 = vector.load %arg5[%c0_113, %c4_114, %c0_115, %c0_116] : memref<1x8x16x16xf32, #tpu.memory_space<vmem>>, vector<1x1x16x16xf32>
    %203 = vector.shape_cast %202 : vector<1x1x16x16xf32> to vector<16x16xf32>
    %204 = vector.shape_cast %201 : vector<16x16xf32> to vector<1x1x16x16xf32>
    tpu.vector_store %arg5[%c0_113, %c4_114, %c0_115, %c0_116], %204 {strides = array<i32>} : memref<1x8x16x16xf32, #tpu.memory_space<vmem>>, vector<1x1x16x16xf32>,
    %c5 = arith.constant 5 : index
    %205 = memref.load %arg3[%c5] : memref<8xf32, #tpu.memory_space<smem>>
    %206 = vector.broadcast %205 : f32 to vector<16x16xf32>
    %c0_i32_117 = arith.constant 0 : i32
    %c20_i32 = arith.constant 20 : i32
    %207 = arith.addi %c20_i32, %c0_i32_117 : i32
    %208 = arith.index_cast %207 : i32 to index
    %209 = memref.load %arg2[%208] : memref<32xf32, #tpu.memory_space<smem>>
    %c0_118 = arith.constant 0 : index
    %210 = arith.index_cast %c0_i32_117 : i32 to index
    %c0_119 = arith.constant 0 : index
    %c0_120 = arith.constant 0 : index
    %211 = vector.load %arg4[%c0_118, %210, %c0_119, %c0_120] : memref<1x4x16x16xf32, #tpu.memory_space<vmem>>, vector<1x1x16x16xf32>
    %212 = vector.shape_cast %211 : vector<1x1x16x16xf32> to vector<16x16xf32>
    %213 = vector.broadcast %209 : f32 to vector<16x16xf32>
    %214 = arith.mulf %213, %212 : vector<16x16xf32>
    %215 = arith.addf %206, %214 : vector<16x16xf32>
    %c1_i32_121 = arith.constant 1 : i32
    %c20_i32_122 = arith.constant 20 : i32
    %216 = arith.addi %c20_i32_122, %c1_i32_121 : i32
    %217 = arith.index_cast %216 : i32 to index
    %218 = memref.load %arg2[%217] : memref<32xf32, #tpu.memory_space<smem>>
    %c0_123 = arith.constant 0 : index
    %219 = arith.index_cast %c1_i32_121 : i32 to index
    %c0_124 = arith.constant 0 : index
    %c0_125 = arith.constant 0 : index
    %220 = vector.load %arg4[%c0_123, %219, %c0_124, %c0_125] : memref<1x4x16x16xf32, #tpu.memory_space<vmem>>, vector<1x1x16x16xf32>
    %221 = vector.shape_cast %220 : vector<1x1x16x16xf32> to vector<16x16xf32>
    %222 = vector.broadcast %218 : f32 to vector<16x16xf32>
    %223 = arith.mulf %222, %221 : vector<16x16xf32>
    %224 = arith.addf %215, %223 : vector<16x16xf32>
    %c2_i32_126 = arith.constant 2 : i32
    %c20_i32_127 = arith.constant 20 : i32
    %225 = arith.addi %c20_i32_127, %c2_i32_126 : i32
    %226 = arith.index_cast %225 : i32 to index
    %227 = memref.load %arg2[%226] : memref<32xf32, #tpu.memory_space<smem>>
    %c0_128 = arith.constant 0 : index
    %228 = arith.index_cast %c2_i32_126 : i32 to index
    %c0_129 = arith.constant 0 : index
    %c0_130 = arith.constant 0 : index
    %229 = vector.load %arg4[%c0_128, %228, %c0_129, %c0_130] : memref<1x4x16x16xf32, #tpu.memory_space<vmem>>, vector<1x1x16x16xf32>
    %230 = vector.shape_cast %229 : vector<1x1x16x16xf32> to vector<16x16xf32>
    %231 = vector.broadcast %227 : f32 to vector<16x16xf32>
    %232 = arith.mulf %231, %230 : vector<16x16xf32>
    %233 = arith.addf %224, %232 : vector<16x16xf32>
    %c3_i32_131 = arith.constant 3 : i32
    %c20_i32_132 = arith.constant 20 : i32
    %234 = arith.addi %c20_i32_132, %c3_i32_131 : i32
    %235 = arith.index_cast %234 : i32 to index
    %236 = memref.load %arg2[%235] : memref<32xf32, #tpu.memory_space<smem>>
    %c0_133 = arith.constant 0 : index
    %237 = arith.index_cast %c3_i32_131 : i32 to index
    %c0_134 = arith.constant 0 : index
    %c0_135 = arith.constant 0 : index
    %238 = vector.load %arg4[%c0_133, %237, %c0_134, %c0_135] : memref<1x4x16x16xf32, #tpu.memory_space<vmem>>, vector<1x1x16x16xf32>
    %239 = vector.shape_cast %238 : vector<1x1x16x16xf32> to vector<16x16xf32>
    %240 = vector.broadcast %236 : f32 to vector<16x16xf32>
    %241 = arith.mulf %240, %239 : vector<16x16xf32>
    %242 = arith.addf %233, %241 : vector<16x16xf32>
    %c4_i32_136 = arith.constant 4 : i32
    %c0_137 = arith.constant 0 : index
    %c5_138 = arith.constant 5 : index
    %c0_139 = arith.constant 0 : index
    %c0_140 = arith.constant 0 : index
    %243 = vector.load %arg5[%c0_137, %c5_138, %c0_139, %c0_140] : memref<1x8x16x16xf32, #tpu.memory_space<vmem>>, vector<1x1x16x16xf32>
    %244 = vector.shape_cast %243 : vector<1x1x16x16xf32> to vector<16x16xf32>
    %245 = vector.shape_cast %242 : vector<16x16xf32> to vector<1x1x16x16xf32>
    tpu.vector_store %arg5[%c0_137, %c5_138, %c0_139, %c0_140], %245 {strides = array<i32>} : memref<1x8x16x16xf32, #tpu.memory_space<vmem>>, vector<1x1x16x16xf32>,
    %c6 = arith.constant 6 : index
    %246 = memref.load %arg3[%c6] : memref<8xf32, #tpu.memory_space<smem>>
    %247 = vector.broadcast %246 : f32 to vector<16x16xf32>
    %c0_i32_141 = arith.constant 0 : i32
    %c24_i32 = arith.constant 24 : i32
    %248 = arith.addi %c24_i32, %c0_i32_141 : i32
    %249 = arith.index_cast %248 : i32 to index
    %250 = memref.load %arg2[%249] : memref<32xf32, #tpu.memory_space<smem>>
    %c0_142 = arith.constant 0 : index
    %251 = arith.index_cast %c0_i32_141 : i32 to index
    %c0_143 = arith.constant 0 : index
    %c0_144 = arith.constant 0 : index
    %252 = vector.load %arg4[%c0_142, %251, %c0_143, %c0_144] : memref<1x4x16x16xf32, #tpu.memory_space<vmem>>, vector<1x1x16x16xf32>
    %253 = vector.shape_cast %252 : vector<1x1x16x16xf32> to vector<16x16xf32>
    %254 = vector.broadcast %250 : f32 to vector<16x16xf32>
    %255 = arith.mulf %254, %253 : vector<16x16xf32>
    %256 = arith.addf %247, %255 : vector<16x16xf32>
    %c1_i32_145 = arith.constant 1 : i32
    %c24_i32_146 = arith.constant 24 : i32
    %257 = arith.addi %c24_i32_146, %c1_i32_145 : i32
    %258 = arith.index_cast %257 : i32 to index
    %259 = memref.load %arg2[%258] : memref<32xf32, #tpu.memory_space<smem>>
    %c0_147 = arith.constant 0 : index
    %260 = arith.index_cast %c1_i32_145 : i32 to index
    %c0_148 = arith.constant 0 : index
    %c0_149 = arith.constant 0 : index
    %261 = vector.load %arg4[%c0_147, %260, %c0_148, %c0_149] : memref<1x4x16x16xf32, #tpu.memory_space<vmem>>, vector<1x1x16x16xf32>
    %262 = vector.shape_cast %261 : vector<1x1x16x16xf32> to vector<16x16xf32>
    %263 = vector.broadcast %259 : f32 to vector<16x16xf32>
    %264 = arith.mulf %263, %262 : vector<16x16xf32>
    %265 = arith.addf %256, %264 : vector<16x16xf32>
    %c2_i32_150 = arith.constant 2 : i32
    %c24_i32_151 = arith.constant 24 : i32
    %266 = arith.addi %c24_i32_151, %c2_i32_150 : i32
    %267 = arith.index_cast %266 : i32 to index
    %268 = memref.load %arg2[%267] : memref<32xf32, #tpu.memory_space<smem>>
    %c0_152 = arith.constant 0 : index
    %269 = arith.index_cast %c2_i32_150 : i32 to index
    %c0_153 = arith.constant 0 : index
    %c0_154 = arith.constant 0 : index
    %270 = vector.load %arg4[%c0_152, %269, %c0_153, %c0_154] : memref<1x4x16x16xf32, #tpu.memory_space<vmem>>, vector<1x1x16x16xf32>
    %271 = vector.shape_cast %270 : vector<1x1x16x16xf32> to vector<16x16xf32>
    %272 = vector.broadcast %268 : f32 to vector<16x16xf32>
    %273 = arith.mulf %272, %271 : vector<16x16xf32>
    %274 = arith.addf %265, %273 : vector<16x16xf32>
    %c3_i32_155 = arith.constant 3 : i32
    %c24_i32_156 = arith.constant 24 : i32
    %275 = arith.addi %c24_i32_156, %c3_i32_155 : i32
    %276 = arith.index_cast %275 : i32 to index
    %277 = memref.load %arg2[%276] : memref<32xf32, #tpu.memory_space<smem>>
    %c0_157 = arith.constant 0 : index
    %278 = arith.index_cast %c3_i32_155 : i32 to index
    %c0_158 = arith.constant 0 : index
    %c0_159 = arith.constant 0 : index
    %279 = vector.load %arg4[%c0_157, %278, %c0_158, %c0_159] : memref<1x4x16x16xf32, #tpu.memory_space<vmem>>, vector<1x1x16x16xf32>
    %280 = vector.shape_cast %279 : vector<1x1x16x16xf32> to vector<16x16xf32>
    %281 = vector.broadcast %277 : f32 to vector<16x16xf32>
    %282 = arith.mulf %281, %280 : vector<16x16xf32>
    %283 = arith.addf %274, %282 : vector<16x16xf32>
    %c4_i32_160 = arith.constant 4 : i32
    %c0_161 = arith.constant 0 : index
    %c6_162 = arith.constant 6 : index
    %c0_163 = arith.constant 0 : index
    %c0_164 = arith.constant 0 : index
    %284 = vector.load %arg5[%c0_161, %c6_162, %c0_163, %c0_164] : memref<1x8x16x16xf32, #tpu.memory_space<vmem>>, vector<1x1x16x16xf32>
    %285 = vector.shape_cast %284 : vector<1x1x16x16xf32> to vector<16x16xf32>
    %286 = vector.shape_cast %283 : vector<16x16xf32> to vector<1x1x16x16xf32>
    tpu.vector_store %arg5[%c0_161, %c6_162, %c0_163, %c0_164], %286 {strides = array<i32>} : memref<1x8x16x16xf32, #tpu.memory_space<vmem>>, vector<1x1x16x16xf32>,
    %c7 = arith.constant 7 : index
    %287 = memref.load %arg3[%c7] : memref<8xf32, #tpu.memory_space<smem>>
    %288 = vector.broadcast %287 : f32 to vector<16x16xf32>
    %c0_i32_165 = arith.constant 0 : i32
    %c28_i32 = arith.constant 28 : i32
    %289 = arith.addi %c28_i32, %c0_i32_165 : i32
    %290 = arith.index_cast %289 : i32 to index
    %291 = memref.load %arg2[%290] : memref<32xf32, #tpu.memory_space<smem>>
    %c0_166 = arith.constant 0 : index
    %292 = arith.index_cast %c0_i32_165 : i32 to index
    %c0_167 = arith.constant 0 : index
    %c0_168 = arith.constant 0 : index
    %293 = vector.load %arg4[%c0_166, %292, %c0_167, %c0_168] : memref<1x4x16x16xf32, #tpu.memory_space<vmem>>, vector<1x1x16x16xf32>
    %294 = vector.shape_cast %293 : vector<1x1x16x16xf32> to vector<16x16xf32>
    %295 = vector.broadcast %291 : f32 to vector<16x16xf32>
    %296 = arith.mulf %295, %294 : vector<16x16xf32>
    %297 = arith.addf %288, %296 : vector<16x16xf32>
    %c1_i32_169 = arith.constant 1 : i32
    %c28_i32_170 = arith.constant 28 : i32
    %298 = arith.addi %c28_i32_170, %c1_i32_169 : i32
    %299 = arith.index_cast %298 : i32 to index
    %300 = memref.load %arg2[%299] : memref<32xf32, #tpu.memory_space<smem>>
    %c0_171 = arith.constant 0 : index
    %301 = arith.index_cast %c1_i32_169 : i32 to index
    %c0_172 = arith.constant 0 : index
    %c0_173 = arith.constant 0 : index
    %302 = vector.load %arg4[%c0_171, %301, %c0_172, %c0_173] : memref<1x4x16x16xf32, #tpu.memory_space<vmem>>, vector<1x1x16x16xf32>
    %303 = vector.shape_cast %302 : vector<1x1x16x16xf32> to vector<16x16xf32>
    %304 = vector.broadcast %300 : f32 to vector<16x16xf32>
    %305 = arith.mulf %304, %303 : vector<16x16xf32>
    %306 = arith.addf %297, %305 : vector<16x16xf32>
    %c2_i32_174 = arith.constant 2 : i32
    %c28_i32_175 = arith.constant 28 : i32
    %307 = arith.addi %c28_i32_175, %c2_i32_174 : i32
    %308 = arith.index_cast %307 : i32 to index
    %309 = memref.load %arg2[%308] : memref<32xf32, #tpu.memory_space<smem>>
    %c0_176 = arith.constant 0 : index
    %310 = arith.index_cast %c2_i32_174 : i32 to index
    %c0_177 = arith.constant 0 : index
    %c0_178 = arith.constant 0 : index
    %311 = vector.load %arg4[%c0_176, %310, %c0_177, %c0_178] : memref<1x4x16x16xf32, #tpu.memory_space<vmem>>, vector<1x1x16x16xf32>
    %312 = vector.shape_cast %311 : vector<1x1x16x16xf32> to vector<16x16xf32>
    %313 = vector.broadcast %309 : f32 to vector<16x16xf32>
    %314 = arith.mulf %313, %312 : vector<16x16xf32>
    %315 = arith.addf %306, %314 : vector<16x16xf32>
    %c3_i32_179 = arith.constant 3 : i32
    %c28_i32_180 = arith.constant 28 : i32
    %316 = arith.addi %c28_i32_180, %c3_i32_179 : i32
    %317 = arith.index_cast %316 : i32 to index
    %318 = memref.load %arg2[%317] : memref<32xf32, #tpu.memory_space<smem>>
    %c0_181 = arith.constant 0 : index
    %319 = arith.index_cast %c3_i32_179 : i32 to index
    %c0_182 = arith.constant 0 : index
    %c0_183 = arith.constant 0 : index
    %320 = vector.load %arg4[%c0_181, %319, %c0_182, %c0_183] : memref<1x4x16x16xf32, #tpu.memory_space<vmem>>, vector<1x1x16x16xf32>
    %321 = vector.shape_cast %320 : vector<1x1x16x16xf32> to vector<16x16xf32>
    %322 = vector.broadcast %318 : f32 to vector<16x16xf32>
    %323 = arith.mulf %322, %321 : vector<16x16xf32>
    %324 = arith.addf %315, %323 : vector<16x16xf32>
    %c4_i32_184 = arith.constant 4 : i32
    %c0_185 = arith.constant 0 : index
    %c7_186 = arith.constant 7 : index
    %c0_187 = arith.constant 0 : index
    %c0_188 = arith.constant 0 : index
    %325 = vector.load %arg5[%c0_185, %c7_186, %c0_187, %c0_188] : memref<1x8x16x16xf32, #tpu.memory_space<vmem>>, vector<1x1x16x16xf32>
    %326 = vector.shape_cast %325 : vector<1x1x16x16xf32> to vector<16x16xf32>
    %327 = vector.shape_cast %324 : vector<16x16xf32> to vector<1x1x16x16xf32>
    tpu.vector_store %arg5[%c0_185, %c7_186, %c0_187, %c0_188], %327 {strides = array<i32>} : memref<1x8x16x16xf32, #tpu.memory_space<vmem>>, vector<1x1x16x16xf32>,
    return
  }
  func.func @transform_0(%arg0: i32, %arg1: i32, %arg2: memref<32xf32, #tpu.memory_space<smem>>, %arg3: memref<8xf32, #tpu.memory_space<smem>>) -> (i32, i32, i32, i32) {
    %c0_i32 = arith.constant 0 : i32
    %c0_i32_0 = arith.constant 0 : i32
    %c0_i32_1 = arith.constant 0 : i32
    return %arg0, %c0_i32, %arg1, %c0_i32_0 : i32, i32, i32, i32
  }
  func.func @transform_1(%arg0: i32, %arg1: i32, %arg2: memref<32xf32, #tpu.memory_space<smem>>, %arg3: memref<8xf32, #tpu.memory_space<smem>>) -> (i32, i32, i32, i32) {
    %c0_i32 = arith.constant 0 : i32
    %c0_i32_0 = arith.constant 0 : i32
    %c0_i32_1 = arith.constant 0 : i32
    return %arg0, %c0_i32, %arg1, %c0_i32_0 : i32, i32, i32, i32
  }
}

</mosaic_0001>

<bundles_post_ra>
// kernel: tpu_custom_call.1
= control target key start
LH: loop header
LB: loop body
LE: loop exit
PB: predicated region body
PF: predicated region fallthrough
CT: control target
= control target key end

     0   :  { %s884_s12 = smov [#allocation3]   ;;  %s1285_s0 = inlined_call_operand.hbm [shape: f32[32], index: 0, kind: input, shape index: {}]   ;;  %s1286_s2 = inlined_call_operand.hbm [shape: f32[2,4,16,16], index: 2, kind: input, shape index: {}]   ;;  %s1287_s3 = inlined_call_operand.hbm [shape: f32[2,8,16,16], index: 3, kind: output, shape index: {}]   ;;  %s1288_s1 = inlined_call_operand.vmem [shape: f32[8], index: 1, kind: input, shape index: {}]  }
   0x1   :  { %9 = dma.hbm_to_smem %s1285_s0, 16, %s884_s12, [#allocation2] }
   0x2   :  { %s10_s17 = sshll.u32 %s1288_s1, 4  ;;  %s11_s17 = int_to_ptr.vmem [resolvable:$true] %s10_s17 }
   0x3   :  { %s760_s18 = scalar_lea.vmem %s11_s17, 16  ;;  %p765_p1 = scmp.lt.s32.totalorder %s11_s17, %s11_s17 }
   0x4   :  { %p761_p0 = scmp.ne.s32.totalorder %s11_s17, %s760_s18  ;;  %p766_p2 = scmp.lt.s32.totalorder %s760_s18, %s760_s18 }
   0x6   :  { %p767_p3 = por %p766_p2, %p765_p1 }
   0x8   :  { %p768_p4 = pnand %p767_p3, %p761_p0 }
   0xa   :  { %771 = shalt.err (!%p768_p4)  }
   0xb   :  { %s885_s19 = smov [#allocation4]  }
   0xc   :  { %13 = dma.vmem_to_smem %s11_s17, 16, %s885_s19, [#allocation2] }
   0xd   :  { %850 = dma.done.wait [#allocation2], 32 }
   0xe   :  { %851 = vsyncadd [#allocation2], 4294967264 }
   0xf   :  { %15 = sfence }
  0x10   :  { %16 = vsyncpa [#allocation6], 0 }
  0x11   :  { %18 = vsyncpa [#allocation6 + $0x1], 0 }
  0x12   :  { %19 = vsyncpa [#allocation7], 0 }
  0x13   :  { %21 = vsyncpa [#allocation7 + $0x1], 0  ;;  %s918_s0 = smov 0   ;;  %s920_s1 = smov 0  }
  0x14   :  { %s922_s20 = smov 0   ;;  %s924_s21 = smov 0  }
  0x15   :  { %s926_s22 = smov 0   ;;  %s928_s23 = smov 0  }
  0x16 LB: > { %s567_s24 = sadd.s32 4294967295, %s882_s23   ;;  %s568_s25 = sadd.s32 4294967294, %s882_s23   ;;  %s882_s23 = sphi %s928_s23, %s27_s23   ;;  %s878_s22 = sphi %s926_s22, %s1299_s22   ;;  %s874_s21 = sphi %s924_s21, %s1298_s21   ;;  %s870_s20 = sphi %s922_s20, %s1297_s20   ;;  %s866_s1 = sphi %s920_s1, %s1296_s1   ;;  %s862_s0 = sphi %s918_s0, %s1295_s0  }
  0x17   : > { %s39_s26 = sadd.s32 1, %s878_s22  ;;  %s48_s27 = sadd.s32 1, %s870_s20 }
  0x18   : > { %p41_p5 = scmp.ge.s32.totalorder %s39_s26, 2  ;;  %p55_p6 = scmp.ne.s32.totalorder %s870_s20, %s866_s1 }
  0x19   : > { %p56_p7 = scmp.eq.s32.totalorder %s882_s23, 0  ;;  %p61_p8 = scmp.ne.s32.totalorder %s866_s1, %s862_s0 }
  0x1a   : > { %s1301_s26 = smov (%p41_p5, %s39_s26), 0  ;;  %p62_p10 = scmp.eq.s32.totalorder %s567_s24, 0 }
  0x1b   : > { %p959_p9 = por %p56_p7, %p55_p6  ;;  %s43_s29 = ssub.s32 %s878_s22, %s1301_s26 }
  0x1c   : > { %p87_p11 = scmp.eq.s32.totalorder %s567_s24, 1  ;;  %p46_p12 = scmp.eq.s32.totalorder %s43_s29, 0 }
  0x1d   : > { %p965_p13 = por %p62_p10, %p61_p8  ;;  %p93_p1 = scmp.eq.s32.totalorder %s568_s25, 1 }
  0x1e   : > { %p969_p0 = por %p87_p11, %p55_p6  ;;  %p696_p4 = scmp.lt.s32.totalorder %s882_s23, 2 }
  0x1f   : > { %s974_s5 = scalar_select %p46_p12, %s870_s20, %s48_s27  }
  0x20   : > { %p976_p2 = por %p93_p1, %p61_p8  ;;  %s113_s7 = sand.u32 1, %s870_s20  }
  0x21   : > { %s571_s8 = sshll.u32 %s113_s7, 6  ;;  %s682_s9 = sshll.u32 %s878_s22, 10 }
  0x22   : > { %s125_s12 = scalar_lea.hbm %s1286_s2, %s682_s9  ;;  %s117_s13 = scalar_lea.vmem [#allocation5], %s571_s8 }
  0x23   : > { %s126_s14 = sshll.u32 %s117_s13, 4  ;;  %p989_p5 = pnand %p696_p4, %p959_p9  ;;  %s127_s14 = int_to_ptr.vmem [resolvable:$true] %s126_s14 }
  0x24   : > { %p574_p6 = scmp.ge.s32.totalorder %s882_s23, 1  ;;  %s114_s16 = scalar_lea.sflag [#allocation6], %s113_s7 }
  0x25   : > { %p774_p7 = pneg %p989_p5  ;;  %s785_s17 = scalar_lea.vmem %s127_s14, 1024 }
  0x26   : > { %p786_p8 = scmp.ne.s32.totalorder %s127_s14, %s785_s17  ;;  %s886_s18 = smov [#allocation5]  }
  0x27   : > { %s790_s19 = sshll.u32 %s886_s18, 4  ;;  %s791_s19 = int_to_ptr.vmem [resolvable:$false] %s790_s19 }
  0x28   : > { %p788_p10 = pnand %p786_p8, %p774_p7  ;;  %s792_s24 = scalar_lea.vmem %s791_s19, 2048 }
  0x29   : > { %p793_p12 = scmp.lt.s32.totalorder %s127_s14, %s791_s19  ;;  %p794_p1 = scmp.lt.s32.totalorder %s792_s24, %s785_s17 }
  0x2a   : > { %p789_p11 = pneg %p788_p10 }
  0x2b   : > { %p795_p3 = por %p794_p1, %p793_p12 }
  0x2d   : > { %p796_p9 = pnand %p795_p3, %p789_p11 }
  0x2f   : > { %799 = shalt.err (!%p796_p9)
}
  0x30   : > { %s887_s25 = smov 128   ;;  %s888_s27 = smov 8  }
  0x31   : > { %691 = dma.hbm_to_vmem [thread:$0]  (!%p989_p5), %s125_s12, 1024, %s127_s14, %s114_s16, %s887_s25, %s887_s25, %s888_s27  }
  0x32   : > { %p134_p4 = scmp.lt.s32.totalorder %s882_s23, 3 }
  0x34   : > { %p135_p7 = pnand %p574_p6, %p134_p4 }
  0x35   : > { %s1002_s28 = sand.u32 (!%p135_p7), 1, %s866_s1  }
  0x36   : > { %138 = sbr.rel (%p135_p7) target bundleno = 131 (0x83), region = 24  ;;  %s575_s29 = sshll.u32 (!%p135_p7), %s1002_s28, 6 }
  0x37   : > { %s141_s7 = scalar_lea.sflag (!%p135_p7), [#allocation6], %s1002_s28  ;;  %s144_s8 = scalar_lea.vmem (!%p135_p7), [#allocation5], %s575_s29 }
  0x3b   : > { %853 = dma.done.wait (%p965_p13), %s141_s7, 1024  }
  0x3c   : > { %855 = vsyncadd (%p965_p13), %s141_s7, 4294966272  ;;  %s165_s9 = sld [smem:[#allocation4]]  ;;  %v1012_v1 = vld [vmem:[%s144_s8] sm:$0xff]  ;;  %v1014_v2 = vld [vmem:[%s144_s8 + $0x10] sm:$0xff]  ;;  %s576_s24 = sshll.u32 %s1002_s28, 7  ;;  %vm202_vm0 = vcmask 130048  }
  0x3d   : > { %s167_s10 = sld [smem:[#allocation3]]  ;;  %v1018_v4 = vld [vmem:[%s144_s8 + $0x20] sm:$0xff]  ;;  %v1020_v5 = vld [vmem:[%s144_s8 + $0x8] sm:$0xff]  ;;  %v1022_v6 = vld [vmem:[%s144_s8 + $0x18] sm:$0xff] }
  0x3e   : > { %s577_s11 = sld [smem:[#allocation3 + $0x1]]  ;;  %v1027_v9 = vld [vmem:[%s144_s8 + $0x30] sm:$0xff]  ;;  %v1030_v11 = vld [vmem:[%s144_s8 + $0x28] sm:$0xff]  ;;  %v1032_v12 = vld [vmem:[%s144_s8 + $0x38] sm:$0xff] }
  0x3f   : > { %s580_s12 = sld [smem:[#allocation3 + $0x2]] }
  0x40   : > { %s583_s13 = sld [smem:[#allocation3 + $0x3]] }
  0x41   : > { %s1010_s14 = sld [smem:[#allocation4 + $0x1]] }
  0x42   : > { %v166_v0 = vstv %s165_s9  ;;  %s1016_s15 = sld [smem:[#allocation3 + $0x4]] }
  0x43   : > { %v170_v3 = vstv %s167_s10  ;;  %s1024_s30 = sld [smem:[#allocation3 + $0x5]]  ;;  %s1074_s10 = scalar_lea.vmem [#allocation8], %s576_s24 }
  0x44   : > { %v171_v7 = vmul.f32 %v170_v3, %v1012_v1  ;;  %v179_v8 = vstv %s577_s11  ;;  %v172_v10 = vmul.f32 %v170_v3, %v1020_v5  ;;  %s1034_s16 = sld [smem:[#allocation3 + $0x6]] }
  0x45   : > { %v180_v13 = vmul.f32 %v1014_v2, %v179_v8  ;;  %v188_v14 = vstv %s580_s12  ;;  %v181_v15 = vmul.f32 %v1022_v6, %v179_v8  ;;  %s1038_s17 = sld [smem:[#allocation3 + $0x7]] }
  0x46   : > { %v173_v16 = vadd.f32 %v171_v7, %v166_v0  ;;  %v189_v17 = vmul.f32 %v1018_v4, %v188_v14  ;;  %v197_v18 = vstv %s583_s13  ;;  %v174_v19 = vadd.f32 %v172_v10, %v166_v0  ;;  %s1041_s18 = sld [smem:[#allocation4 + $0x2]] }
  0x47   : > { %v198_v20 = vmul.f32 %v1027_v9, %v197_v18  ;;  %v190_v21 = vmul.f32 %v1030_v11, %v188_v14  ;;  %v199_v22 = vmul.f32 %v1032_v12, %v197_v18  ;;  %s1046_s19 = sld [smem:[#allocation3 + $0x8]]  ;;  %v206_v25 = vstv %s1010_s14 }
  0x48   : > { %v182_v23 = vadd.f32 %v180_v13, %v173_v16  ;;  %v183_v24 = vadd.f32 %v181_v15, %v174_v19  ;;  %v210_v26 = vstv %s1016_s15  ;;  %s1051_s25 = sld [smem:[#allocation3 + $0x9]] }
  0x49   : > { %v211_v27 = vmul.f32 %v210_v26, %v1012_v1  ;;  %v218_v28 = vstv %s1024_s30  ;;  %v212_v29 = vmul.f32 %v210_v26, %v1020_v5  ;;  %s1056_s27 = sld [smem:[#allocation3 + $0xa]] }
  0x4a   : > { %v191_v30 = vadd.f32 %v189_v17, %v182_v23  ;;  %v192_v31 = vadd.f32 %v190_v21, %v183_v24  ;;  %v219_v32 = vmul.f32 %v1014_v2, %v218_v28  ;;  %v226_v33 = vstv %s1034_s16  ;;  %s1060_s29 = sld [smem:[#allocation3 + $0xb]] }
  0x4b   : > { %v213_v34 = vadd.f32 %v211_v27, %v206_v25  ;;  %v227_v35 = vmul.f32 %v1018_v4, %v226_v33  ;;  %v234_v36 = vstv %s1038_s17  ;;  %v214_v37 = vadd.f32 %v212_v29, %v206_v25  ;;  %s1064_s7 = sld [smem:[#allocation4 + $0x3]] }
  0x4c   : > { %v200_v38 = vadd.f32 %v198_v20, %v191_v30  ;;  %v201_v39 = vadd.f32 %v199_v22, %v192_v31  ;;  %v220_v40 = vmul.f32 %v1022_v6, %v218_v28  ;;  %s1067_s8 = sld [smem:[#allocation3 + $0xc]]  ;;  %v235_v42 = vmul.f32 %v1027_v9, %v234_v36 }
  0x4d   : > { %v221_v41 = vadd.f32 %v219_v32, %v213_v34  ;;  %v228_v43 = vmul.f32 %v1030_v11, %v226_v33  ;;  %v236_v44 = vmul.f32 %v1032_v12, %v234_v36  ;;  %s1072_s9 = sld [smem:[#allocation3 + $0xd]]  ;;  %v243_v46 = vstv %s1041_s18 }
  0x4e   : > { %203 = vst.msk [vmem:[%s1074_s10] sm:$0xff] %vm202_vm0, %v200_v38  ;;  %204 = vst.msk [vmem:[%s1074_s10 + $0x8] sm:$0xff] %vm202_vm0, %v201_v39  ;;  %v222_v45 = vadd.f32 %v220_v40, %v214_v37  ;;  %v247_v47 = vstv %s1046_s19  ;;  %v255_v48 = vstv %s1051_s25  ;;  %s1083_s11 = sld [smem:[#allocation3 + $0xe]] }
  0x4f   : > { %v229_v49 = vadd.f32 %v227_v35, %v221_v41  ;;  %v248_v50 = vmul.f32 %v247_v47, %v1012_v1  ;;  %v256_v51 = vmul.f32 %v1014_v2, %v255_v48  ;;  %v263_v52 = vstv %s1056_s27  ;;  %s1088_s12 = sld [smem:[#allocation3 + $0xf]] }
  0x50   : > { %v230_v53 = vadd.f32 %v228_v43, %v222_v45  ;;  %v264_v54 = vmul.f32 %v1018_v4, %v263_v52  ;;  %v271_v55 = vstv %s1060_s29  ;;  %v249_v56 = vmul.f32 %v247_v47, %v1020_v5  ;;  %s1093_s13 = sld [smem:[#allocation4 + $0x4]] }
  0x51   : > { %v237_v57 = vadd.f32 %v235_v42, %v229_v49  ;;  %v250_v58 = vadd.f32 %v248_v50, %v243_v46  ;;  %v272_v59 = vmul.f32 %v1027_v9, %v271_v55  ;;  %v257_v60 = vmul.f32 %v1022_v6, %v255_v48  ;;  %s1097_s14 = sld [smem:[#allocation3 + $0x10]] }
  0x52   : > { %v238_v61 = vadd.f32 %v236_v44, %v230_v53  ;;  %v251_v62 = vadd.f32 %v249_v56, %v243_v46  ;;  %v265_v63 = vmul.f32 %v1030_v11, %v263_v52  ;;  %v273_v0 = vmul.f32 %v1032_v12, %v271_v55  ;;  %s1101_s15 = sld [smem:[#allocation3 + $0x11]] }
  0x53   : > { %597 = vst.msk [vmem:[%s1074_s10 + $0x10] sm:$0xff] %vm202_vm0, %v237_v57  ;;  %v258_v3 = vadd.f32 %v256_v51, %v250_v58  ;;  %v280_v7 = vstv %s1064_s7  ;;  %v284_v8 = vstv %s1067_s8  ;;  %v292_v10 = vstv %s1072_s9  ;;  %s1108_s30 = sld [smem:[#allocation3 + $0x12]] }
  0x54   : > { %598 = vst.msk [vmem:[%s1074_s10 + $0x18] sm:$0xff] %vm202_vm0, %v238_v61  ;;  %v259_v13 = vadd.f32 %v257_v60, %v251_v62  ;;  %v285_v14 = vmul.f32 %v284_v8, %v1012_v1  ;;  %v293_v15 = vmul.f32 %v1014_v2, %v292_v10  ;;  %v300_v16 = vstv %s1083_s11  ;;  %s1115_s16 = sld [smem:[#allocation3 + $0x13]] }
  0x55   : > { %v266_v17 = vadd.f32 %v264_v54, %v258_v3  ;;  %v301_v18 = vmul.f32 %v1018_v4, %v300_v16  ;;  %v308_v19 = vstv %s1088_s12  ;;  %v286_v20 = vmul.f32 %v284_v8, %v1020_v5  ;;  %s1120_s17 = sld [smem:[#allocation4 + $0x5]] }
  0x56   : > { %v267_v21 = vadd.f32 %v265_v63, %v259_v13  ;;  %v287_v22 = vadd.f32 %v285_v14, %v280_v7  ;;  %v309_v23 = vmul.f32 %v1027_v9, %v308_v19  ;;  %v294_v24 = vmul.f32 %v1022_v6, %v292_v10  ;;  %s1124_s18 = sld [smem:[#allocation3 + $0x14]] }
  0x57   : > { %v274_v25 = vadd.f32 %v272_v59, %v266_v17  ;;  %v288_v26 = vadd.f32 %v286_v20, %v280_v7  ;;  %v302_v27 = vmul.f32 %v1030_v11, %v300_v16  ;;  %v310_v28 = vmul.f32 %v1032_v12, %v308_v19  ;;  %s1128_s19 = sld [smem:[#allocation3 + $0x15]] }
  0x58   : > { %v275_v29 = vadd.f32 %v273_v0, %v267_v21  ;;  %v295_v30 = vadd.f32 %v293_v15, %v287_v22  ;;  %v317_v31 = vstv %s1093_s13  ;;  %v321_v32 = vstv %s1097_s14  ;;  %s1132_s24 = sld [smem:[#allocation3 + $0x16]] }
  0x59   : > { %610 = vst.msk [vmem:[%s1074_s10 + $0x20] sm:$0xff] %vm202_vm0, %v274_v25  ;;  %v296_v33 = vadd.f32 %v294_v24, %v288_v26  ;;  %v322_v34 = vmul.f32 %v321_v32, %v1012_v1  ;;  %v329_v35 = vstv %s1101_s15  ;;  %v337_v36 = vstv %s1108_s30  ;;  %s1139_s25 = sld [smem:[#allocation3 + $0x17]]  ;;  %s683_s30 = sshll.u32 %s874_s21, 11 }
  0x5a   : > { %611 = vst.msk [vmem:[%s1074_s10 + $0x28] sm:$0xff] %vm202_vm0, %v275_v29  ;;  %v303_v37 = vadd.f32 %v301_v18, %v295_v30  ;;  %v330_v38 = vmul.f32 %v1014_v2, %v329_v35  ;;  %v345_v39 = vstv %s1115_s16  ;;  %s1145_s27 = sld [smem:[#allocation4 + $0x6]]  ;;  %v338_v42 = vmul.f32 %v1018_v4, %v337_v36  ;;  %s480_s16 = sshll.u32 %s1074_s10, 4  ;;  %s1233_s16 = int_to_ptr.vmem [resolvable:$true] %s480_s16 }
  0x5b   : > { %v304_v40 = vadd.f32 %v302_v27, %v296_v33  ;;  %v324_v41 = vadd.f32 %v322_v34, %v317_v31  ;;  %v323_v43 = vmul.f32 %v321_v32, %v1020_v5  ;;  %s1149_s29 = sld [smem:[#allocation3 + $0x18]]  ;;  %v346_v45 = vmul.f32 %v1027_v9, %v345_v39  ;;  %s800_s21 = scalar_lea.vmem %s1233_s16, 2048 }
  0x5c   : > { %v311_v44 = vadd.f32 %v309_v23, %v303_v37  ;;  %v331_v46 = vmul.f32 %v1022_v6, %v329_v35  ;;  %v339_v47 = vmul.f32 %v1030_v11, %v337_v36  ;;  %s1154_s7 = sld [smem:[#allocation3 + $0x19]]  ;;  %v347_v51 = vmul.f32 %v1032_v12, %v345_v39  ;;  %p801_p13 = scmp.ne.s32.totalorder %s1233_s16, %s800_s21 }
  0x5d   : > { %v312_v48 = vadd.f32 %v310_v28, %v304_v40  ;;  %v332_v49 = vadd.f32 %v330_v38, %v324_v41  ;;  %v325_v50 = vadd.f32 %v323_v43, %v317_v31  ;;  %s1157_s8 = sld [smem:[#allocation3 + $0x1a]]  ;;  %v354_v52 = vstv %s1120_s17 }
  0x5e   : > { %623 = vst.msk [vmem:[%s1074_s10 + $0x30] sm:$0xff] %vm202_vm0, %v311_v44  ;;  %v358_v53 = vstv %s1124_s18  ;;  %v366_v54 = vstv %s1128_s19  ;;  %v374_v55 = vstv %s1132_s24  ;;  %s1165_s9 = sld [smem:[#allocation3 + $0x1b]]  ;;  %s1231_s19 = scalar_lea.hbm %s1287_s3, %s683_s30 }
  0x5f   : > { %624 = vst.msk [vmem:[%s1074_s10 + $0x38] sm:$0xff] %vm202_vm0, %v312_v48  ;;  %v340_v56 = vadd.f32 %v338_v42, %v332_v49  ;;  %v333_v57 = vadd.f32 %v331_v46, %v325_v50  ;;  %v359_v58 = vmul.f32 %v358_v53, %v1012_v1  ;;  %v367_v59 = vmul.f32 %v1014_v2, %v366_v54  ;;  %s1171_s11 = sld [smem:[#allocation4 + $0x7]]  ;;  %s465_s24 = scalar_lea.sflag [#allocation7], %s1002_s28 }
  0x60   : > { %v375_v60 = vmul.f32 %v1018_v4, %v374_v55  ;;  %v382_v61 = vstv %s1139_s25  ;;  %v360_v62 = vmul.f32 %v358_v53, %v1020_v5  ;;  %v368_v63 = vmul.f32 %v1022_v6, %v366_v54  ;;  %s1177_s12 = sld [smem:[#allocation3 + $0x1c]]  ;;  %p802_p3 = pnand %p801_p13, %p969_p0 }
  0x61   : > { %v348_v0 = vadd.f32 %v346_v45, %v340_v56  ;;  %v341_v3 = vadd.f32 %v339_v47, %v333_v57  ;;  %v361_v7 = vadd.f32 %v359_v58, %v354_v52  ;;  %v383_v8 = vmul.f32 %v1027_v9, %v382_v61  ;;  %s1180_s13 = sld [smem:[#allocation3 + $0x1d]]  ;;  %s889_s25 = smov [#allocation8]  }
  0x62   : > { %v362_v10 = vadd.f32 %v360_v62, %v354_v52  ;;  %v376_v13 = vmul.f32 %v1030_v11, %v374_v55  ;;  %v384_v14 = vmul.f32 %v1032_v12, %v382_v61  ;;  %v391_v15 = vstv %s1145_s27  ;;  %s1185_s14 = sld [smem:[#allocation3 + $0x1e]]  ;;  %p803_p5 = pneg %p802_p3 }
  0x63   : > { %636 = vst.msk [vmem:[%s1074_s10 + $0x40] sm:$0xff] %vm202_vm0, %v348_v0  ;;  %v349_v16 = vadd.f32 %v347_v51, %v341_v3  ;;  %v369_v17 = vadd.f32 %v367_v59, %v361_v7  ;;  %v395_v18 = vstv %s1149_s29  ;;  %v403_v19 = vstv %s1154_s7  ;;  %s1191_s15 = sld [smem:[#allocation3 + $0x1f]]  ;;  %s804_s27 = sshll.u32 %s889_s25, 4  ;;  %s805_s27 = int_to_ptr.vmem [resolvable:$false] %s804_s27 }
  0x64   : > { %v370_v20 = vadd.f32 %v368_v63, %v362_v10  ;;  %v396_v21 = vmul.f32 %v395_v18, %v1012_v1  ;;  %v404_v22 = vmul.f32 %v1014_v2, %v403_v19  ;;  %v411_v23 = vstv %s1157_s8  ;;  %s806_s29 = scalar_lea.vmem %s805_s27, 4096  ;;  %p807_p6 = scmp.lt.s32.totalorder %s1233_s16, %s805_s27 }
  0x65   : > { %637 = vst.msk [vmem:[%s1074_s10 + $0x48] sm:$0xff] %vm202_vm0, %v349_v16  ;;  %v377_v24 = vadd.f32 %v375_v60, %v369_v17  ;;  %v412_v25 = vmul.f32 %v1018_v4, %v411_v23  ;;  %v419_v26 = vstv %s1165_s9  ;;  %v397_v27 = vmul.f32 %v395_v18, %v1020_v5  ;;  %p808_p8 = scmp.lt.s32.totalorder %s806_s29, %s800_s21 }
  0x66   : > { %v378_v28 = vadd.f32 %v376_v13, %v370_v20  ;;  %v398_v29 = vadd.f32 %v396_v21, %v391_v15  ;;  %v420_v30 = vmul.f32 %v1027_v9, %v419_v26  ;;  %v405_v31 = vmul.f32 %v1022_v6, %v403_v19 }
  0x67   : > { %v385_v32 = vadd.f32 %v383_v8, %v377_v24  ;;  %v399_v33 = vadd.f32 %v397_v27, %v391_v15  ;;  %v413_v34 = vmul.f32 %v1030_v11, %v411_v23  ;;  %v421_v35 = vmul.f32 %v1032_v12, %v419_v26  ;;  %p809_p10 = por %p808_p8, %p807_p6 }
  0x68   : > { %v386_v36 = vadd.f32 %v384_v14, %v378_v28  ;;  %v406_v37 = vadd.f32 %v404_v22, %v398_v29  ;;  %v428_v38 = vstv %s1171_s11  ;;  %v432_v39 = vstv %s1177_s12 }
  0x69   : > { %649 = vst.msk [vmem:[%s1074_s10 + $0x50] sm:$0xff] %vm202_vm0, %v385_v32  ;;  %v407_v40 = vadd.f32 %v405_v31, %v399_v33  ;;  %v433_v41 = vmul.f32 %v432_v39, %v1012_v1  ;;  %v440_v42 = vstv %s1180_s13  ;;  %v448_v43 = vstv %s1185_s14  ;;  %p810_p11 = pnand %p809_p10, %p803_p5 }
  0x6a   : > { %650 = vst.msk [vmem:[%s1074_s10 + $0x58] sm:$0xff] %vm202_vm0, %v386_v36  ;;  %v414_v44 = vadd.f32 %v412_v25, %v406_v37  ;;  %v441_v45 = vmul.f32 %v1014_v2, %v440_v42  ;;  %v456_v46 = vstv %s1191_s15  ;;  %v449_v49 = vmul.f32 %v1018_v4, %v448_v43 }
  0x6b   : > { %v415_v47 = vadd.f32 %v413_v34, %v407_v40  ;;  %v435_v48 = vadd.f32 %v433_v41, %v428_v38  ;;  %v434_v50 = vmul.f32 %v432_v39, %v1020_v5  ;;  %v457_v1 = vmul.f32 %v1027_v9, %v456_v46 }
  0x6c   : > { %v422_v51 = vadd.f32 %v420_v30, %v414_v44  ;;  %v442_v52 = vmul.f32 %v1022_v6, %v440_v42  ;;  %v450_v2 = vmul.f32 %v1030_v11, %v448_v43  ;;  %v458_v56 = vmul.f32 %v1032_v12, %v456_v46 }
  0x6d   : > { %v423_v53 = vadd.f32 %v421_v35, %v415_v47  ;;  %v443_v54 = vadd.f32 %v441_v45, %v435_v48  ;;  %v436_v55 = vadd.f32 %v434_v50, %v428_v38 }
  0x6e   : > { %662 = vst.msk [vmem:[%s1074_s10 + $0x60] sm:$0xff] %vm202_vm0, %v422_v51 }
  0x6f   : > { %663 = vst.msk [vmem:[%s1074_s10 + $0x68] sm:$0xff] %vm202_vm0, %v423_v53  ;;  %v451_v4 = vadd.f32 %v449_v49, %v443_v54  ;;  %v444_v5 = vadd.f32 %v442_v52, %v436_v55 }
  0x71   : > { %v459_v6 = vadd.f32 %v457_v1, %v451_v4  ;;  %v452_v9 = vadd.f32 %v450_v2, %v444_v5 }
  0x73   : > { %675 = vst.msk [vmem:[%s1074_s10 + $0x70] sm:$0xff] %vm202_vm0, %v459_v6  ;;  %v460_v11 = vadd.f32 %v458_v56, %v452_v9 }
  0x75   : > { %676 = vst.msk [vmem:[%s1074_s10 + $0x78] sm:$0xff] %vm202_vm0, %v460_v11 }
  0x76   : > { %813 = shalt.err (!%p810_p11)
}
  0x77   : > { %s814_s10 = scalar_lea.hbm %s1231_s19, 2048  ;;  %s818_s9 = scalar_lea.hbm %s1287_s3, 4096 }
  0x78   : > { %p815_p12 = scmp.ne.s32.totalorder %s1231_s19, %s814_s10  ;;  %p819_p4 = scmp.lt.s32.totalorder %s1231_s19, %s1287_s3 }
  0x79   : > { %p820_p7 = scmp.lt.s32.totalorder %s818_s9, %s814_s10 }
  0x7a   : > { %p816_p1 = pnand %p815_p12, %p969_p0 }
  0x7b   : > { %p821_p13 = por %p820_p7, %p819_p4 }
  0x7c   : > { %p817_p9 = pneg %p816_p1 }
  0x7e   : > { %p822_p3 = pnand %p821_p13, %p817_p9 }
  0x80   : > { %825 = shalt.err (!%p822_p3)
}
  0x81   : > { %s890_s13 = smov 128   ;;  %s891_s14 = smov 8  }
  0x82   : > { %686 = dma.vmem_to_hbm [thread:$0]  (%p969_p0), %s1233_s16, 2048, %s1231_s19, %s465_s24, %s890_s13, %s890_s13, %s891_s14  }
  0x83 PF: > { %s495_s15 = sand.u32 1, %s862_s0   ;;  %p1294_p5 = scmp.ge.s32.totalorder %s882_s23, 2 }
  0x84   : > { %s496_s30 = scalar_lea.sflag [#allocation7], %s495_s15 }
  0x85   : > { %p693_p6 = pnand %p1294_p5, %p976_p2 }
  0x87   : > { %p694_p8 = pneg %p693_p6 }
  0x89   : > { %857 = dma.done.wait (%p694_p8), %s496_s30, 2048  }
  0x8a   : > { %859 = vsyncadd (%p694_p8), %s496_s30, 4294965248  ;;  %s27_s23 = sadd.s32 1, %s882_s23   ;;  %s1295_s0 = smov %s866_s1 }
  0x8b   : > { %p24_p10 = scmp.ge.s32.totalorder %s27_s23, 4   ;;  %s1296_s1 = smov %s870_s20 }
  0x8c   : > { %s1297_s20 = smov %s974_s5  ;;  %s1298_s21 = smov %s878_s22 }
  0x8d   : > { %s1299_s22 = smov %s1301_s26  ;;  %26 = sbr.rel (!%p24_p10) target bundleno = 22 (0x16), region = 79 }
  0x92   :  { %501 = vsyncpa [#allocation6], 1 }
  0x93   :  { %503 = vsyncpa [#allocation6 + $0x1], 1 }
  0x94   :  { %504 = vsyncpa [#allocation7], 1 }
  0x95   :  { %506 = vsyncpa [#allocation7 + $0x1], 1 }

</bundles_post_ra>
